<compile_context>
chip_gen: v5e
topology: v5e:2x2
jax: 0.10.0
libtpu: 0.0.40
codegen_flags: <defaults>
</compile_context>

<pallas_src>
import functools

import jax
import jax.numpy as jnp
from jax.experimental import pallas as pl
from jax.experimental.pallas import tpu as pltpu


def _contrastive_kernel(x_ref, w1_ref, b1_ref, w2_ref, b2_ref, o_ref):
    # fc1: (TM, Cin_p) @ (Cin_p, Cin_p) -- bf16 operands, f32 accumulation.
    h = jnp.dot(x_ref[...], w1_ref[...], preferred_element_type=jnp.float32)
    h = jnp.maximum(h + b1_ref[...], 0.0)            # bias + ReLU in f32
    # fc2: (TM, Cin_p) @ (Cin_p, Cout_p)
    y = jnp.dot(h.astype(w2_ref.dtype), w2_ref[...],
                preferred_element_type=jnp.float32)
    y = y + b2_ref[...]
    # F.normalize(y, dim=1): y / max(||y||_2, 1e-12) == y * rsqrt(max(sq, 1e-24)).
    # Padded output channels are exactly zero, so the norm is the true norm.
    sq = jnp.sum(y * y, axis=-1, keepdims=True)
    inv = jax.lax.rsqrt(jnp.maximum(sq, 1e-24))      # EUP rsqrt, then multiply
    o_ref[...] = (y * inv).astype(o_ref.dtype)


def _round_up(v, m):
    return ((v + m - 1) // m) * m


@functools.partial(jax.jit, static_argnames=("block_rows",))
def contrastive_layer(x, w1, b1, w2, b2, *, block_rows=512):
    """Fused ContrastiveLayer forward.

    x : (N, C_in)
    w1: (C_in, C_in)   (transposed vs. torch's (out, in) layout)
    b1: (C_in,)
    w2: (C_in, C_out)
    b2: (C_out,)
    returns (N, C_out), rows L2-normalized.
    """
    n, c_in = x.shape
    c_out = w2.shape[1]

    # Lane-pad channels to 128; pick a row tile and pad N up to a multiple.
    c_in_p = _round_up(c_in, 128)
    c_out_p = _round_up(c_out, 128)
    bm = min(block_rows, _round_up(n, 16))
    n_p = _round_up(n, bm)

    # Zero-pad and cast matmul operands to bf16; keep biases in f32.
    x_p = jnp.zeros((n_p, c_in_p), jnp.bfloat16).at[:n, :c_in].set(
        x.astype(jnp.bfloat16))
    w1_p = jnp.zeros((c_in_p, c_in_p), jnp.bfloat16).at[:c_in, :c_in].set(
        w1.astype(jnp.bfloat16))
    w2_p = jnp.zeros((c_in_p, c_out_p), jnp.bfloat16).at[:c_in, :c_out].set(
        w2.astype(jnp.bfloat16))
    b1_p = jnp.zeros((1, c_in_p), jnp.float32).at[0, :c_in].set(
        b1.astype(jnp.float32))
    b2_p = jnp.zeros((1, c_out_p), jnp.float32).at[0, :c_out].set(
        b2.astype(jnp.float32))

    grid = (n_p // bm,)

    out = pl.pallas_call(
        _contrastive_kernel,
        out_shape=jax.ShapeDtypeStruct((n_p, c_out_p), jnp.float32),
        grid_spec=pltpu.PrefetchScalarGridSpec(
            num_scalar_prefetch=0,
            grid=grid,
            in_specs=[
                pl.BlockSpec((bm, c_in_p), lambda i: (i, 0)),       # x tile
                pl.BlockSpec((c_in_p, c_in_p), lambda i: (0, 0)),   # w1 (resident)
                pl.BlockSpec((1, c_in_p), lambda i: (0, 0)),        # b1
                pl.BlockSpec((c_in_p, c_out_p), lambda i: (0, 0)),  # w2 (resident)
                pl.BlockSpec((1, c_out_p), lambda i: (0, 0)),       # b2
            ],
            out_specs=pl.BlockSpec((bm, c_out_p), lambda i: (i, 0)),
        ),
        compiler_params=pltpu.CompilerParams(
            dimension_semantics=("parallel",)),
    )(x_p, w1_p, b1_p, w2_p, b2_p)

    # TODO(synk): for very large C_in (>= ~2048) add a K-tiled grid axis with a
    # VMEM accumulator instead of keeping the full (C_in, C_in) W1 resident.
    return out[:n, :c_out].astype(x.dtype)


def reference_forward(x, w1, b1, w2, b2, matmul_dtype=jnp.float32):
    """Pure-JAX reference with the same precision choices as the kernel."""
    md = matmul_dtype
    h = jax.lax.dot(x.astype(md), w1.astype(md),
                    precision=jax.lax.Precision.HIGHEST,
                    preferred_element_type=jnp.float32) + b1
    h = jnp.maximum(h, 0.0)
    y = jax.lax.dot(h.astype(md), w2.astype(md),
                    precision=jax.lax.Precision.HIGHEST,
                    preferred_element_type=jnp.float32) + b2
    norm = jnp.maximum(jnp.sqrt(jnp.sum(y * y, axis=1, keepdims=True)), 1e-12)
    return y / norm


if __name__ == "__main__":
    # Small shapes consistent with the module: N ROI features of dim in_channels,
    # projected to out_channels.
    N, C_IN, C_OUT = 8, 32, 16

    key = jax.random.PRNGKey(0)
    kx, k1, k2, k3, k4 = jax.random.split(key, 5)

    x = jax.random.normal(kx, (N, C_IN), dtype=jnp.float32)

    # Deterministic synthetic parameters (shapes from nn.Linear), stored
    # pre-transposed as (in, out) for the kernel.
    w1 = jax.random.normal(k1, (C_IN, C_IN), dtype=jnp.float32) * (1.0 / jnp.sqrt(C_IN))
    b1 = jax.random.normal(k2, (C_IN,), dtype=jnp.float32) * 0.01
    w2 = jax.random.normal(k3, (C_IN, C_OUT), dtype=jnp.float32) * (1.0 / jnp.sqrt(C_IN))
    b2 = jax.random.normal(k4, (C_OUT,), dtype=jnp.float32) * 0.01

    out = contrastive_layer(x, w1, b1, w2, b2)
    out = jax.block_until_ready(out)
    assert out.shape == (N, C_OUT)

    # Exact-semantics check: bf16 operands + f32 accumulation, same as kernel.
    ref_bf16 = reference_forward(x, w1, b1, w2, b2, matmul_dtype=jnp.bfloat16)
    assert jnp.allclose(out, ref_bf16, atol=1e-4, rtol=1e-4), \
        "mismatch vs bf16-semantics reference"

    # Loose check against the full-f32 reference (bf16 rounding budget only).
    ref_f32 = reference_forward(x, w1, b1, w2, b2, matmul_dtype=jnp.float32)
    assert jnp.allclose(out, ref_f32, atol=3e-2, rtol=3e-2), \
        "mismatch vs f32 reference"

    print("KERNEL_OK")
</pallas_src>

<mosaic_0001>
module attributes {stable_mosaic.version = 11 : i64} {
  func.func @_contrastive_kernel(%arg0: i32, %arg1: memref<16x128xbf16, #tpu.memory_space<vmem>>, %arg2: memref<128x128xbf16, #tpu.memory_space<vmem>>, %arg3: memref<1x128xf32, #tpu.memory_space<vmem>>, %arg4: memref<128x128xbf16, #tpu.memory_space<vmem>>, %arg5: memref<1x128xf32, #tpu.memory_space<vmem>>, %arg6: memref<16x128xf32, #tpu.memory_space<vmem>>) attributes {dimension_semantics = [#tpu.dimension_semantics<parallel>], iteration_bounds = array<i64: 1>, scalar_prefetch = 0 : i64, scratch_operands = 0 : i64, tpu.core_type = #tpu.core_type<tc>, window_params = [{transform_indices = @transform_0, window_bounds = array<i64: 16, 128>}, {pipeline_mode = #tpu.pipeline_mode<synchronous>, transform_indices = @transform_1, window_bounds = array<i64: 128, 128>}, {pipeline_mode = #tpu.pipeline_mode<synchronous>, transform_indices = @transform_2, window_bounds = array<i64: 1, 128>}, {pipeline_mode = #tpu.pipeline_mode<synchronous>, transform_indices = @transform_3, window_bounds = array<i64: 128, 128>}, {pipeline_mode = #tpu.pipeline_mode<synchronous>, transform_indices = @transform_4, window_bounds = array<i64: 1, 128>}, {transform_indices = @transform_5, window_bounds = array<i64: 16, 128>}]} {
    %c0 = arith.constant 0 : index
    %c0_0 = arith.constant 0 : index
    %0 = vector.load %arg1[%c0, %c0_0] : memref<16x128xbf16, #tpu.memory_space<vmem>>, vector<16x128xbf16>
    %c0_1 = arith.constant 0 : index
    %c0_2 = arith.constant 0 : index
    %1 = vector.load %arg2[%c0_1, %c0_2] : memref<128x128xbf16, #tpu.memory_space<vmem>>, vector<128x128xbf16>
    %cst = arith.constant dense<0.000000e+00> : vector<16x128xf32>
    %2 = tpu.matmul %0, %1, %cst {dimension_numbers = #tpu.dot_dimension_numbers<[1], [0], [0], [1], [0, 0, 1, 1], [], []>} : vector<16x128xbf16>, vector<128x128xbf16>, vector<16x128xf32> -> vector<16x128xf32>
    %c0_3 = arith.constant 0 : index
    %c0_4 = arith.constant 0 : index
    %3 = vector.load %arg3[%c0_3, %c0_4] : memref<1x128xf32, #tpu.memory_space<vmem>>, vector<1x128xf32>
    %4 = vector.broadcast %3 : vector<1x128xf32> to vector<16x128xf32>
    %5 = arith.addf %2, %4 : vector<16x128xf32>
    %cst_5 = arith.constant 0.000000e+00 : f32
    %6 = vector.broadcast %cst_5 : f32 to vector<16x128xf32>
    %7 = arith.maximumf %5, %6 : vector<16x128xf32>
    %8 = arith.truncf %7 : vector<16x128xf32> to vector<16x128xbf16>
    %c0_6 = arith.constant 0 : index
    %c0_7 = arith.constant 0 : index
    %9 = vector.load %arg4[%c0_6, %c0_7] : memref<128x128xbf16, #tpu.memory_space<vmem>>, vector<128x128xbf16>
    %cst_8 = arith.constant dense<0.000000e+00> : vector<16x128xf32>
    %10 = tpu.matmul %8, %9, %cst_8 {dimension_numbers = #tpu.dot_dimension_numbers<[1], [0], [0], [1], [0, 0, 1, 1], [], []>} : vector<16x128xbf16>, vector<128x128xbf16>, vector<16x128xf32> -> vector<16x128xf32>
    %c0_9 = arith.constant 0 : index
    %c0_10 = arith.constant 0 : index
    %11 = vector.load %arg5[%c0_9, %c0_10] : memref<1x128xf32, #tpu.memory_space<vmem>>, vector<1x128xf32>
    %12 = vector.broadcast %11 : vector<1x128xf32> to vector<16x128xf32>
    %13 = arith.addf %10, %12 : vector<16x128xf32>
    %14 = arith.mulf %13, %13 : vector<16x128xf32>
    %cst_11 = arith.constant dense<0.000000e+00> : vector<16xf32>
    %15 = vector.multi_reduction <add>, %14, %cst_11 [1] : vector<16x128xf32> to vector<16xf32>
    %16 = vector.shape_cast %15 : vector<16xf32> to vector<16x1xf32>
    %cst_12 = arith.constant 1.000000e-24 : f32
    %17 = vector.broadcast %cst_12 : f32 to vector<16x1xf32>
    %18 = arith.maximumf %16, %17 : vector<16x1xf32>
    %19 = math.rsqrt %18 : vector<16x1xf32>
    %20 = vector.broadcast %19 : vector<16x1xf32> to vector<16x128xf32>
    %21 = arith.mulf %13, %20 : vector<16x128xf32>
    %c0_13 = arith.constant 0 : index
    %c0_14 = arith.constant 0 : index
    %22 = vector.load %arg6[%c0_13, %c0_14] : memref<16x128xf32, #tpu.memory_space<vmem>>, vector<16x128xf32>
    tpu.vector_store %arg6[%c0_13, %c0_14], %21 {strides = array<i32>} : memref<16x128xf32, #tpu.memory_space<vmem>>, vector<16x128xf32>,
    return
  }
  func.func @transform_0(%arg0: i32) -> (i32, i32) {
    %c0_i32 = arith.constant 0 : i32
    %c0_i32_0 = arith.constant 0 : i32
    return %arg0, %c0_i32 : i32, i32
  }
  func.func @transform_1(%arg0: i32) -> (i32, i32) {
    %c0_i32 = arith.constant 0 : i32
    %c0_i32_0 = arith.constant 0 : i32
    %c0_i32_1 = arith.constant 0 : i32
    return %c0_i32, %c0_i32_0 : i32, i32
  }
  func.func @transform_2(%arg0: i32) -> (i32, i32) {
    %c0_i32 = arith.constant 0 : i32
    %c0_i32_0 = arith.constant 0 : i32
    %c0_i32_1 = arith.constant 0 : i32
    return %c0_i32, %c0_i32_0 : i32, i32
  }
  func.func @transform_3(%arg0: i32) -> (i32, i32) {
    %c0_i32 = arith.constant 0 : i32
    %c0_i32_0 = arith.constant 0 : i32
    %c0_i32_1 = arith.constant 0 : i32
    return %c0_i32, %c0_i32_0 : i32, i32
  }
  func.func @transform_4(%arg0: i32) -> (i32, i32) {
    %c0_i32 = arith.constant 0 : i32
    %c0_i32_0 = arith.constant 0 : i32
    %c0_i32_1 = arith.constant 0 : i32
    return %c0_i32, %c0_i32_0 : i32, i32
  }
  func.func @transform_5(%arg0: i32) -> (i32, i32) {
    %c0_i32 = arith.constant 0 : i32
    %c0_i32_0 = arith.constant 0 : i32
    return %arg0, %c0_i32 : i32, i32
  }
}

</mosaic_0001>

<bundles_post_ra>
// kernel: contrastive_layer.1
= control target key start
LH: loop header
LB: loop body
LE: loop exit
PB: predicated region body
PF: predicated region fallthrough
CT: control target
= control target key end

     0   :  { %s415_s1 = inlined_call_operand.vmem [shape: bf16[128,128], index: 1, kind: input, shape index: {}]   ;;  %s416_s3 = inlined_call_operand.vmem [shape: bf16[128,128], index: 3, kind: input, shape index: {}]   ;;  %s417_s2 = inlined_call_operand.vmem [shape: f32[1,128], index: 2, kind: input, shape index: {}]   ;;  %s418_s0 = inlined_call_operand.vmem [shape: bf16[16,128], index: 0, kind: input, shape index: {}]   ;;  %s419_s4 = inlined_call_operand.vmem [shape: f32[1,128], index: 4, kind: input, shape index: {}]   ;;  %s420_s5 = inlined_call_operand.vmem [shape: f32[16,128], index: 5, kind: output, shape index: {}]  }
   0x1   :  { %v307_v0 = vld [vmem:[%s415_s1 + $0x38] sm:$0xff]  ;;  %v306_v1 = vld [vmem:[%s415_s1 + $0x30] sm:$0xff]  ;;  %v305_v4 = vld [vmem:[%s415_s1 + $0x28] sm:$0xff] }
   0x2   :  { %96 = vmatpush.bf16.msra.mxu0 %v307_v0  ;;  %v315_v2 = vld [vmem:[%s416_s3 + $0x38] sm:$0xff]  ;;  %v314_v3 = vld [vmem:[%s416_s3 + $0x30] sm:$0xff]  ;;  %v313_v5 = vld [vmem:[%s416_s3 + $0x28] sm:$0xff] }
   0x3   :  { %181 = vmatpush.bf16.msra.mxu1 %v315_v2  ;;  %v304_v6 = vld [vmem:[%s415_s1 + $0x20] sm:$0xff]  ;;  %v303_v8 = vld [vmem:[%s415_s1 + $0x18] sm:$0xff]  ;;  %v302_v9 = vld [vmem:[%s415_s1 + $0x10] sm:$0xff] }
   0x4   :  { %v312_v7 = vld [vmem:[%s416_s3 + $0x20] sm:$0xff]  ;;  %v301_v10 = vld [vmem:[%s415_s1 + $0x8] sm:$0xff]  ;;  %v311_v13 = vld [vmem:[%s416_s3 + $0x18] sm:$0xff] }
   0x5   :  { %v300_v11 = vld [vmem:[%s415_s1] sm:$0xff]  ;;  %v310_v14 = vld [vmem:[%s416_s3 + $0x10] sm:$0xff]  ;;  %v309_v15 = vld [vmem:[%s416_s3 + $0x8] sm:$0xff] }
   0x6   :  { %97 = vmatpush.bf16.msra.mxu0 %v306_v1  ;;  %v299_v12 = vld [vmem:[%s418_s0] sm:$0xff] }
   0x7   :  { %182 = vmatpush.bf16.msra.mxu1 %v314_v3  ;;  %v308_v16 = vld [vmem:[%s416_s3] sm:$0xff] }
   0x8   :  { %v316_v18 = vld [vmem:[%s417_s2] ss:$0 sm:$0xff] }
   0x9   :  { %v317_v25 = vld [vmem:[%s419_s4] ss:$0 sm:$0xff] }
   0xa   :  { %98 = vmatpush.bf16.msra.mxu0 %v305_v4 }
   0xb   :  { %183 = vmatpush.bf16.msra.mxu1 %v313_v5 }
   0xe   :  { %99 = vmatpush.bf16.msra.mxu0 %v304_v6 }
   0xf   :  { %184 = vmatpush.bf16.msra.mxu1 %v312_v7 }
  0x12   :  { %100 = vmatpush.bf16.msra.mxu0 %v303_v8 }
  0x13   :  { %185 = vmatpush.bf16.msra.mxu1 %v311_v13 }
  0x16   :  { %101 = vmatpush.bf16.msra.mxu0 %v302_v9 }
  0x17   :  { %186 = vmatpush.bf16.msra.mxu1 %v310_v14 }
  0x1a   :  { %102 = vmatpush.bf16.msra.mxu0 %v301_v10 }
  0x1b   :  { %187 = vmatpush.bf16.msra.mxu1 %v309_v15 }
  0x1e   :  { %103 = vmatpush.bf16.msra.mxu0 %v300_v11 }
  0x1f   :  { %188 = vmatpush.bf16.msra.mxu1 %v308_v16 }
  0x21   :  { %104 = vmatmul.bf16.vlgmr.msra.gmra.mxu0 %v299_v12 }
  0x9e   :  { %v105_v17 = vpop.f32.mrf.mxu0 }
  0x9f   :  { %v106_v19 = vadd.f32 %v316_v18, %v105_v17 }
  0xa1   :  { %v110_v22 = vmax.f32 %v106_v19, 0.0 }
  0xa6   :  { %v107_v20 = vpop.f32.mrf.mxu0 }
  0xa7   :  { %v108_v21 = vadd.f32 %v316_v18, %v107_v20 }
  0xa9   :  { %v111_v23 = vmax.f32 %v108_v21, 0.0 }
  0xab   :  { %v112_v24 = vpack.c.bf16 %v111_v23, %v110_v22 }
  0xad   :  { %189 = vmatmul.bf16.vlgmr.msra.gmra.mxu1 %v112_v24 }
 0x12a   :  { %v190_v26 = vpop.f32.mrf.mxu1 }
 0x12b   :  { %v191_v27 = vadd.f32 %v317_v25, %v190_v26 }
 0x12d   :  { %v195_v28 = vmul.f32 %v191_v27, %v191_v27 }
 0x12f   :  { %197 = vadd.xlane.f32.xlu0 %v195_v28 }
 0x132   :  { %v192_v29 = vpop.f32.mrf.mxu1 }
 0x133   :  { %v193_v30 = vadd.f32 %v317_v25, %v192_v29 }
 0x135   :  { %v196_v31 = vmul.f32 %v193_v30, %v193_v30 }
 0x137   :  { %199 = vadd.xlane.f32.xlu0 %v196_v31 }
 0x1a2   :  { %v198_v32 = vpop.xlane.xlu0 %197 }
 0x1a3   :  { %v201_v33 = vmax.f32 %v198_v32, 1e-24 }
 0x1a5   :  { %318 = vrsqrt.f32 %v201_v33  ;;  %vm209_vm1 = vweird.f32 %v201_v33 }
 0x1aa   :  { %v200_v34 = vpop.xlane.xlu0 %199 }
 0x1ab   :  { %v319_v35 = vpop.eup %318  ;;  %v202_v36 = vmax.f32 %v200_v34, 1e-24 }
 0x1ac   :  { %v204_v37 = vmul.f32 %v319_v35, %v201_v33  ;;  %vm210_vm0 = vweird.f32 %v319_v35 }
 0x1ad   :  { %320 = vrsqrt.f32 %v202_v36  ;;  %vm211_vm2 = vmor %vm209_vm1, %vm210_vm0  ;;  %vm219_vm4 = vweird.f32 %v202_v36 }
 0x1ae   :  { %v205_v38 = vmul.f32 %v319_v35, %v204_v37 }
 0x1b0   :  { %v206_v39 = vmul.f32 0.5, %v205_v38 }
 0x1b2   :  { %v207_v40 = vsub.f32 1.5, %v206_v39 }
 0x1b3   :  { %v321_v41 = vpop.eup %320 }
 0x1b4   :  { %v208_v42 = vmul.f32 %v319_v35, %v207_v40  ;;  %v214_v43 = vmul.f32 %v321_v41, %v202_v36  ;;  %vm220_vm3 = vweird.f32 %v321_v41 }
 0x1b5   :  { %vm221_vm5 = vmor %vm219_vm4, %vm220_vm3 }
 0x1b6   :  { %v212_v44 = vsel %vm211_vm2, %v319_v35, %v208_v42  ;;  %v215_v45 = vmul.f32 %v321_v41, %v214_v43 }
 0x1b7   :  { %v223_v46 = vmul.f32 %v212_v44, %v191_v27 }
 0x1b8   :  { %v216_v47 = vmul.f32 0.5, %v215_v45 }
 0x1b9   :  { %225 = vst [vmem:[%s420_s5] sm:$0xff] %v223_v46 }
 0x1ba   :  { %v217_v48 = vsub.f32 1.5, %v216_v47 }
 0x1bc   :  { %v218_v49 = vmul.f32 %v321_v41, %v217_v48 }
 0x1be   :  { %v222_v50 = vsel %vm221_vm5, %v321_v41, %v218_v49 }
 0x1bf   :  { %v224_v51 = vmul.f32 %v222_v50, %v193_v30 }
 0x1c1   :  { %226 = vst [vmem:[%s420_s5 + $0x8] sm:$0xff] %v224_v51 }

</bundles_post_ra>
